<compile_context>
chip_gen: v5e
topology: v5e:2x2
jax: 0.10.0
libtpu: 0.0.40
codegen_flags: <defaults>
</compile_context>

<pallas_src>
import jax
import jax.numpy as jnp
from jax.experimental import pallas as pl
from jax.experimental.pallas import tpu as pltpu


# ----------------------------------------------------------------------------
# Kernel: fused MLP chain  h -> (h @ W + b) [-> tanh] ... -> (pred, identity)
# ----------------------------------------------------------------------------
def _make_fused_mlp_kernel(tanh_flags, d_out, compute_dtype):
    tanh_flags = tuple(bool(f) for f in tanh_flags)
    n_layers = len(tanh_flags)

    def kernel(*refs):
        # refs = (x, W0, b0, W1, b1, ..., out_pred, out_identity)
        x_ref = refs[0]
        out_pred_ref = refs[-2]
        out_id_ref = refs[-1]

        h = x_ref[...].astype(compute_dtype)
        for k in range(n_layers):
            w_ref = refs[1 + 2 * k]
            b_ref = refs[2 + 2 * k]
            # MXU matmul with f32 accumulation; bias add stays in f32.
            acc = jnp.dot(h, w_ref[...],
                          preferred_element_type=jnp.float32) + b_ref[...]
            if k == n_layers - 1:
                h = acc                        # keep final result in f32
            else:
                h = acc.astype(compute_dtype)  # narrow activations between layers
                if tanh_flags[k]:
                    h = jnp.tanh(h)            # bf16 tanh on v6e/v7x EUP
        # Final h is (tile, 2*d_out) = [x_pred | x_identity]; split in-register
        # and store directly -> no external slab split re-touching HBM.
        out_pred_ref[...] = h[:, :d_out].astype(out_pred_ref.dtype)
        out_id_ref[...] = h[:, d_out:].astype(out_id_ref.dtype)

    return kernel


# ----------------------------------------------------------------------------
# Batch-tile selection: prefer 4+ grid steps (pipelining + v7x 2-TC sharding),
# tiles in the 256-1024 row sweet spot, multiple of 8 (f32 sublane), dividing B.
# ----------------------------------------------------------------------------
def _pick_batch_tile(B):
    if B <= 512:
        return B  # single step; per-step overhead would dominate such tiny work
    fallback = None
    for cand in range(min(1024, (B // 8) * 8), 7, -8):
        if B % cand != 0:
            continue
        if B // cand >= 4:
            return cand          # largest multiple-of-8 divisor giving >=4 steps
        if fallback is None:
            fallback = cand      # largest divisor tile (2-3 steps)
    return fallback if fallback is not None else B


# ----------------------------------------------------------------------------
# Wrapper
# ----------------------------------------------------------------------------
def ae_fwd_pallas(x, enc_params, fwd_w, dec_params, *, batch_tile=None,
                  use_bf16=True):
    """Fused AE_fwd forward pass.

    x           : (B, D_in) float32
    enc_params  : list of (W (in,out), b (1,out)) for the encoder
    fwd_w       : (latent, latent) forward operator (no bias)
    dec_params  : list of (W (in,out), b (1,out)) for the decoder
    returns (x_pred, x_identity), each (B, D_dec_out) float32
    """
    B, d_in = x.shape
    d_out = dec_params[-1][0].shape[1]
    n_enc = len(enc_params)
    n_dec = len(dec_params)
    compute_dtype = jnp.bfloat16 if use_bf16 else jnp.float32

    # ---- trace-time weight preparation (runs once, outside the kernel) ----
    # Fold the forward operator into the first decoder weight for the prediction
    # path, and lane-concatenate the two paths:  [pred | identity].
    w1, b1 = dec_params[0]
    w1_pred = (fwd_w @ w1).astype(jnp.float32)                  # fold in f32
    layers = list(enc_params)
    layers.append((jnp.concatenate([w1_pred, w1], axis=1),      # (latent, 2*h1)
                   jnp.concatenate([b1, b1], axis=1)))          # (1, 2*h1)
    # Remaining decoder layers act independently on each half -> block-diagonal
    # weights.  All dims <= 128 lanes, so the doubled K/N is free on the MXU
    # (still exactly one 128-wide weight tile on v5e's 128x128 MXU).
    for (w, b) in dec_params[1:]:
        z = jnp.zeros_like(w)
        w_cat = jnp.concatenate(
            [jnp.concatenate([w, z], axis=1),
             jnp.concatenate([z, w], axis=1)], axis=0)          # (2*in, 2*out)
        layers.append((w_cat, jnp.concatenate([b, b], axis=1)))

    # Cast weights (and x) to the compute dtype; biases stay f32 (added to the
    # f32 MXU accumulator).
    layers = [(w.astype(compute_dtype), b.astype(jnp.float32)) for (w, b) in layers]
    x_in = x.astype(compute_dtype)

    # tanh after every layer except the last of the encoder and of the decoder.
    tanh_flags = [True] * (n_enc - 1) + [False] + [True] * (n_dec - 1) + [False]

    # ---- batch tiling ----
    if batch_tile is None:
        batch_tile = _pick_batch_tile(B)
    assert B % batch_tile == 0, "batch must be divisible by batch_tile"
    assert batch_tile == B or batch_tile % 8 == 0, \
        "batch_tile must be a multiple of 8 (f32 sublane) or the full batch"
    grid = (B // batch_tile,)

    flat_inputs = [x_in]
    for (w, b) in layers:
        flat_inputs += [w, b]

    def _const_spec(arr):
        # Whole-array block, constant index map -> stays resident in VMEM.
        nd = arr.ndim
        return pl.BlockSpec(arr.shape, lambda i, _nd=nd: (0,) * _nd)

    in_specs = [pl.BlockSpec((batch_tile, d_in), lambda i: (i, 0))]
    in_specs += [_const_spec(a) for a in flat_inputs[1:]]
    out_specs = [pl.BlockSpec((batch_tile, d_out), lambda i: (i, 0)),
                 pl.BlockSpec((batch_tile, d_out), lambda i: (i, 0))]
    out_shape = (jax.ShapeDtypeStruct((B, d_out), jnp.float32),
                 jax.ShapeDtypeStruct((B, d_out), jnp.float32))

    # ---- cost estimate (advisory) ----
    flops = int(sum(2 * B * w.shape[0] * w.shape[1] for (w, _) in layers))
    transcendentals = int(sum(B * w.shape[1]
                              for (w, _), f in zip(layers, tanh_flags) if f))
    bytes_accessed = int(sum(int(a.size) * a.dtype.itemsize for a in flat_inputs)
                         + 2 * B * d_out * 4)

    kernel = _make_fused_mlp_kernel(tanh_flags, d_out, compute_dtype)

    x_pred, x_identity = pl.pallas_call(
        kernel,
        out_shape=out_shape,
        grid_spec=pltpu.PrefetchScalarGridSpec(
            num_scalar_prefetch=0,
            grid=grid,
            in_specs=in_specs,
            out_specs=out_specs,
        ),
        compiler_params=pltpu.CompilerParams(
            dimension_semantics=("parallel",),
        ),
        cost_estimate=pl.CostEstimate(
            flops=flops,
            transcendentals=transcendentals,
            bytes_accessed=bytes_accessed,
        ),
    )(*flat_inputs)

    return x_pred, x_identity


# ----------------------------------------------------------------------------
# Deterministic parameter init (mimics PyTorch Linear default: U(-1/sqrt(fan_in), .))
# ----------------------------------------------------------------------------
def _init_linear(key, d_in, d_out):
    kw, kb = jax.random.split(key)
    bound = 1.0 / jnp.sqrt(jnp.float32(d_in))
    w = jax.random.uniform(kw, (d_in, d_out), jnp.float32, -bound, bound)
    b = jax.random.uniform(kb, (1, d_out), jnp.float32, -bound, bound)
    return w, b


def _init_mlp(key, layers):
    params = []
    keys = jax.random.split(key, len(layers) - 1)
    for k in range(len(layers) - 1):
        params.append(_init_linear(keys[k], layers[k], layers[k + 1]))
    return params


# ----------------------------------------------------------------------------
# Pure-JAX reference (mirrors the PyTorch module exactly, no folding)
# ----------------------------------------------------------------------------
def ae_fwd_reference(x, enc_params, fwd_w, dec_params):
    h = x
    for k, (w, b) in enumerate(enc_params):
        h = h @ w + b
        if k < len(enc_params) - 1:
            h = jnp.tanh(h)
    z_t = h

    def decode(z):
        hh = z
        for k, (w, b) in enumerate(dec_params):
            hh = hh @ w + b
            if k < len(dec_params) - 1:
                hh = jnp.tanh(hh)
        return hh

    x_identity = decode(z_t)
    z_t1 = z_t @ fwd_w
    x_pred = decode(z_t1)
    return x_pred, x_identity


# ----------------------------------------------------------------------------
# Main
# ----------------------------------------------------------------------------
if __name__ == "__main__":
    # AE_fwd(encoder_layers=[64, 32, 16], forward_layers=[16, 16],
    #        decoder_layers=[16, 32, 64], nonlinearity=nn.Tanh)
    encoder_layers = [64, 32, 16]
    forward_layers = [16, 16]
    decoder_layers = [16, 32, 64]
    batch = 16

    key = jax.random.PRNGKey(0)
    k_x, k_enc, k_fwd, k_dec = jax.random.split(key, 4)

    x = jax.random.normal(k_x, (batch, encoder_layers[0]), jnp.float32)
    enc_params = _init_mlp(k_enc, encoder_layers)
    dec_params = _init_mlp(k_dec, decoder_layers)
    bound = 1.0 / jnp.sqrt(jnp.float32(forward_layers[0]))
    fwd_w = jax.random.uniform(
        k_fwd, (forward_layers[0], forward_layers[1]), jnp.float32, -bound, bound
    )

    ref_pred, ref_identity = ae_fwd_reference(x, enc_params, fwd_w, dec_params)

    # bf16 compute path (default; loose tolerance because weights/activations
    # are narrowed to bf16 for the MXU).
    x_pred, x_identity = ae_fwd_pallas(x, enc_params, fwd_w, dec_params,
                                       use_bf16=True)
    jax.block_until_ready((x_pred, x_identity))
    assert jnp.allclose(x_pred, ref_pred, atol=3e-2, rtol=3e-2)
    assert jnp.allclose(x_identity, ref_identity, atol=3e-2, rtol=3e-2)

    # f32 exact-parity path (fwd_w folding changes FP associativity at ~1e-6).
    x_pred32, x_identity32 = ae_fwd_pallas(x, enc_params, fwd_w, dec_params,
                                           use_bf16=False)
    jax.block_until_ready((x_pred32, x_identity32))
    assert jnp.allclose(x_pred32, ref_pred, atol=1e-5, rtol=1e-5)
    assert jnp.allclose(x_identity32, ref_identity, atol=1e-5, rtol=1e-5)

    print("KERNEL_OK")
</pallas_src>

<mosaic_0001>
module attributes {stable_mosaic.version = 11 : i64} {
  func.func @kernel(%arg0: i32, %arg1: memref<16x64xbf16, #tpu.memory_space<vmem>>, %arg2: memref<64x32xbf16, #tpu.memory_space<vmem>>, %arg3: memref<1x32xf32, #tpu.memory_space<vmem>>, %arg4: memref<32x16xbf16, #tpu.memory_space<vmem>>, %arg5: memref<1x16xf32, #tpu.memory_space<vmem>>, %arg6: memref<16x64xbf16, #tpu.memory_space<vmem>>, %arg7: memref<1x64xf32, #tpu.memory_space<vmem>>, %arg8: memref<64x128xbf16, #tpu.memory_space<vmem>>, %arg9: memref<1x128xf32, #tpu.memory_space<vmem>>, %arg10: memref<16x64xf32, #tpu.memory_space<vmem>>, %arg11: memref<16x64xf32, #tpu.memory_space<vmem>>) attributes {dimension_semantics = [#tpu.dimension_semantics<parallel>], iteration_bounds = array<i64: 1>, scalar_prefetch = 0 : i64, scratch_operands = 0 : i64, tpu.core_type = #tpu.core_type<tc>, window_params = [{transform_indices = @transform_0, window_bounds = array<i64: 16, 64>}, {pipeline_mode = #tpu.pipeline_mode<synchronous>, transform_indices = @transform_1, window_bounds = array<i64: 64, 32>}, {pipeline_mode = #tpu.pipeline_mode<synchronous>, transform_indices = @transform_2, window_bounds = array<i64: 1, 32>}, {pipeline_mode = #tpu.pipeline_mode<synchronous>, transform_indices = @transform_3, window_bounds = array<i64: 32, 16>}, {pipeline_mode = #tpu.pipeline_mode<synchronous>, transform_indices = @transform_4, window_bounds = array<i64: 1, 16>}, {pipeline_mode = #tpu.pipeline_mode<synchronous>, transform_indices = @transform_5, window_bounds = array<i64: 16, 64>}, {pipeline_mode = #tpu.pipeline_mode<synchronous>, transform_indices = @transform_6, window_bounds = array<i64: 1, 64>}, {pipeline_mode = #tpu.pipeline_mode<synchronous>, transform_indices = @transform_7, window_bounds = array<i64: 64, 128>}, {pipeline_mode = #tpu.pipeline_mode<synchronous>, transform_indices = @transform_8, window_bounds = array<i64: 1, 128>}, {transform_indices = @transform_9, window_bounds = array<i64: 16, 64>}, {transform_indices = @transform_10, window_bounds = array<i64: 16, 64>}]} {
    %c0 = arith.constant 0 : index
    %c0_0 = arith.constant 0 : index
    %0 = vector.load %arg1[%c0, %c0_0] : memref<16x64xbf16, #tpu.memory_space<vmem>>, vector<16x64xbf16>
    %c0_1 = arith.constant 0 : index
    %c0_2 = arith.constant 0 : index
    %1 = vector.load %arg2[%c0_1, %c0_2] : memref<64x32xbf16, #tpu.memory_space<vmem>>, vector<64x32xbf16>
    %cst = arith.constant dense<0.000000e+00> : vector<16x32xf32>
    %2 = tpu.matmul %0, %1, %cst {dimension_numbers = #tpu.dot_dimension_numbers<[1], [0], [0], [1], [0, 0, 1, 1], [], []>} : vector<16x64xbf16>, vector<64x32xbf16>, vector<16x32xf32> -> vector<16x32xf32>
    %c0_3 = arith.constant 0 : index
    %c0_4 = arith.constant 0 : index
    %3 = vector.load %arg3[%c0_3, %c0_4] : memref<1x32xf32, #tpu.memory_space<vmem>>, vector<1x32xf32>
    %4 = vector.broadcast %3 : vector<1x32xf32> to vector<16x32xf32>
    %5 = arith.addf %2, %4 : vector<16x32xf32>
    %6 = arith.truncf %5 : vector<16x32xf32> to vector<16x32xbf16>
    %7 = math.tanh %6 : vector<16x32xbf16>
    %c0_5 = arith.constant 0 : index
    %c0_6 = arith.constant 0 : index
    %8 = vector.load %arg4[%c0_5, %c0_6] : memref<32x16xbf16, #tpu.memory_space<vmem>>, vector<32x16xbf16>
    %cst_7 = arith.constant dense<0.000000e+00> : vector<16x16xf32>
    %9 = tpu.matmul %7, %8, %cst_7 {dimension_numbers = #tpu.dot_dimension_numbers<[1], [0], [0], [1], [0, 0, 1, 1], [], []>} : vector<16x32xbf16>, vector<32x16xbf16>, vector<16x16xf32> -> vector<16x16xf32>
    %c0_8 = arith.constant 0 : index
    %c0_9 = arith.constant 0 : index
    %10 = vector.load %arg5[%c0_8, %c0_9] : memref<1x16xf32, #tpu.memory_space<vmem>>, vector<1x16xf32>
    %11 = vector.broadcast %10 : vector<1x16xf32> to vector<16x16xf32>
    %12 = arith.addf %9, %11 : vector<16x16xf32>
    %13 = arith.truncf %12 : vector<16x16xf32> to vector<16x16xbf16>
    %c0_10 = arith.constant 0 : index
    %c0_11 = arith.constant 0 : index
    %14 = vector.load %arg6[%c0_10, %c0_11] : memref<16x64xbf16, #tpu.memory_space<vmem>>, vector<16x64xbf16>
    %cst_12 = arith.constant dense<0.000000e+00> : vector<16x64xf32>
    %15 = tpu.matmul %13, %14, %cst_12 {dimension_numbers = #tpu.dot_dimension_numbers<[1], [0], [0], [1], [0, 0, 1, 1], [], []>} : vector<16x16xbf16>, vector<16x64xbf16>, vector<16x64xf32> -> vector<16x64xf32>
    %c0_13 = arith.constant 0 : index
    %c0_14 = arith.constant 0 : index
    %16 = vector.load %arg7[%c0_13, %c0_14] : memref<1x64xf32, #tpu.memory_space<vmem>>, vector<1x64xf32>
    %17 = vector.broadcast %16 : vector<1x64xf32> to vector<16x64xf32>
    %18 = arith.addf %15, %17 : vector<16x64xf32>
    %19 = arith.truncf %18 : vector<16x64xf32> to vector<16x64xbf16>
    %20 = math.tanh %19 : vector<16x64xbf16>
    %c0_15 = arith.constant 0 : index
    %c0_16 = arith.constant 0 : index
    %21 = vector.load %arg8[%c0_15, %c0_16] : memref<64x128xbf16, #tpu.memory_space<vmem>>, vector<64x128xbf16>
    %cst_17 = arith.constant dense<0.000000e+00> : vector<16x128xf32>
    %22 = tpu.matmul %20, %21, %cst_17 {dimension_numbers = #tpu.dot_dimension_numbers<[1], [0], [0], [1], [0, 0, 1, 1], [], []>} : vector<16x64xbf16>, vector<64x128xbf16>, vector<16x128xf32> -> vector<16x128xf32>
    %c0_18 = arith.constant 0 : index
    %c0_19 = arith.constant 0 : index
    %23 = vector.load %arg9[%c0_18, %c0_19] : memref<1x128xf32, #tpu.memory_space<vmem>>, vector<1x128xf32>
    %24 = vector.broadcast %23 : vector<1x128xf32> to vector<16x128xf32>
    %25 = arith.addf %22, %24 : vector<16x128xf32>
    %26 = vector.extract_strided_slice %25 {offsets = [0, 0], sizes = [16, 64], strides = [1, 1]} : vector<16x128xf32> to vector<16x64xf32>
    %c0_20 = arith.constant 0 : index
    %c0_21 = arith.constant 0 : index
    %27 = vector.load %arg10[%c0_20, %c0_21] : memref<16x64xf32, #tpu.memory_space<vmem>>, vector<16x64xf32>
    tpu.vector_store %arg10[%c0_20, %c0_21], %26 {strides = array<i32>} : memref<16x64xf32, #tpu.memory_space<vmem>>, vector<16x64xf32>,
    %28 = vector.extract_strided_slice %25 {offsets = [0, 64], sizes = [16, 64], strides = [1, 1]} : vector<16x128xf32> to vector<16x64xf32>
    %c0_22 = arith.constant 0 : index
    %c0_23 = arith.constant 0 : index
    %29 = vector.load %arg11[%c0_22, %c0_23] : memref<16x64xf32, #tpu.memory_space<vmem>>, vector<16x64xf32>
    tpu.vector_store %arg11[%c0_22, %c0_23], %28 {strides = array<i32>} : memref<16x64xf32, #tpu.memory_space<vmem>>, vector<16x64xf32>,
    return
  }
  func.func @transform_0(%arg0: i32) -> (i32, i32) {
    %c0_i32 = arith.constant 0 : i32
    %c0_i32_0 = arith.constant 0 : i32
    return %arg0, %c0_i32 : i32, i32
  }
  func.func @transform_1(%arg0: i32) -> (i32, i32) {
    %c0_i32 = arith.constant 0 : i32
    %c0_i32_0 = arith.constant 0 : i32
    %c0_i32_1 = arith.constant 0 : i32
    return %c0_i32, %c0_i32_0 : i32, i32
  }
  func.func @transform_2(%arg0: i32) -> (i32, i32) {
    %c0_i32 = arith.constant 0 : i32
    %c0_i32_0 = arith.constant 0 : i32
    %c0_i32_1 = arith.constant 0 : i32
    return %c0_i32, %c0_i32_0 : i32, i32
  }
  func.func @transform_3(%arg0: i32) -> (i32, i32) {
    %c0_i32 = arith.constant 0 : i32
    %c0_i32_0 = arith.constant 0 : i32
    %c0_i32_1 = arith.constant 0 : i32
    return %c0_i32, %c0_i32_0 : i32, i32
  }
  func.func @transform_4(%arg0: i32) -> (i32, i32) {
    %c0_i32 = arith.constant 0 : i32
    %c0_i32_0 = arith.constant 0 : i32
    %c0_i32_1 = arith.constant 0 : i32
    return %c0_i32, %c0_i32_0 : i32, i32
  }
  func.func @transform_5(%arg0: i32) -> (i32, i32) {
    %c0_i32 = arith.constant 0 : i32
    %c0_i32_0 = arith.constant 0 : i32
    %c0_i32_1 = arith.constant 0 : i32
    return %c0_i32, %c0_i32_0 : i32, i32
  }
  func.func @transform_6(%arg0: i32) -> (i32, i32) {
    %c0_i32 = arith.constant 0 : i32
    %c0_i32_0 = arith.constant 0 : i32
    %c0_i32_1 = arith.constant 0 : i32
    return %c0_i32, %c0_i32_0 : i32, i32
  }
  func.func @transform_7(%arg0: i32) -> (i32, i32) {
    %c0_i32 = arith.constant 0 : i32
    %c0_i32_0 = arith.constant 0 : i32
    %c0_i32_1 = arith.constant 0 : i32
    return %c0_i32, %c0_i32_0 : i32, i32
  }
  func.func @transform_8(%arg0: i32) -> (i32, i32) {
    %c0_i32 = arith.constant 0 : i32
    %c0_i32_0 = arith.constant 0 : i32
    %c0_i32_1 = arith.constant 0 : i32
    return %c0_i32, %c0_i32_0 : i32, i32
  }
  func.func @transform_9(%arg0: i32) -> (i32, i32) {
    %c0_i32 = arith.constant 0 : i32
    %c0_i32_0 = arith.constant 0 : i32
    return %arg0, %c0_i32 : i32, i32
  }
  func.func @transform_10(%arg0: i32) -> (i32, i32) {
    %c0_i32 = arith.constant 0 : i32
    %c0_i32_0 = arith.constant 0 : i32
    return %arg0, %c0_i32 : i32, i32
  }
}

</mosaic_0001>

<bundles_post_ra>
// kernel: tpu_custom_call.1
= control target key start
LH: loop header
LB: loop body
LE: loop exit
PB: predicated region body
PF: predicated region fallthrough
CT: control target
= control target key end

     0   :  { %16 = vsyncpa [#allocation3], 0  ;;  %s533_s0 = inlined_call_operand.vmem [shape: bf16[16,64], index: 0, kind: input, shape index: {}]   ;;  %s534_s1 = inlined_call_operand.vmem [shape: bf16[64,32], index: 1, kind: input, shape index: {}]   ;;  %s535_s2 = inlined_call_operand.vmem [shape: f32[1,32], index: 2, kind: input, shape index: {}]   ;;  %s536_s3 = inlined_call_operand.vmem [shape: bf16[32,16], index: 3, kind: input, shape index: {}]   ;;  %s537_s4 = inlined_call_operand.vmem [shape: f32[1,16], index: 4, kind: input, shape index: {}]   ;;  %s538_s5 = inlined_call_operand.vmem [shape: bf16[16,64], index: 5, kind: input, shape index: {}]   ;;  %s539_s6 = inlined_call_operand.vmem [shape: f32[1,64], index: 6, kind: input, shape index: {}]   ;;  %s540_s7 = inlined_call_operand.vmem [shape: bf16[64,128], index: 7, kind: input, shape index: {}]   ;;  %s541_s8 = inlined_call_operand.vmem [shape: f32[1,128], index: 8, kind: input, shape index: {}]   ;;  %s542_s9 = inlined_call_operand.hbm [shape: f32[16,64], index: 9, kind: output, shape index: {0}]   ;;  %s543_s10 = inlined_call_operand.hbm [shape: f32[16,64], index: 10, kind: output, shape index: {1}]  }
   0x1   :  { %v336_v0 = vld [vmem:[%s534_s1 + $0x18] sm:$0xff]  ;;  %v335_v1 = vld [vmem:[%s534_s1 + $0x10] sm:$0xff] }
   0x2   :  { %88 = vmatpush.bf16.msra.mxu0 %v336_v0 }
   0x3   :  { %17 = vsyncpa [#allocation5], 0  ;;  %v334_v2 = vld [vmem:[%s534_s1 + $0x8] sm:$0xff]  ;;  %v333_v3 = vld [vmem:[%s534_s1] sm:$0xff]  ;;  %vm80_vm0 = vcmask 523264   ;;  %vm124_vm1 = vcmask 261120  }
   0x4   :  { %v332_v4 = vld [vmem:[%s533_s0] sm:$0xff]  ;;  %v338_v5 = vld [vmem:[%s536_s3 + $0x8] sm:$0xff]  ;;  %vm155_vm2 = vcmask 130048   ;;  %v343_v25 = vld [vmem:[%s540_s7 + $0x18] sm:$0xff]  ;;  %s414_s18 = smov [#allocation2]   ;;  %s250_s22 = sshll.u32 %s542_s9, 4  ;;  %s251_s22 = int_to_ptr.hbm [resolvable:$true] %s250_s22 }
   0x5   :  { %134 = vmatpush.bf16.msra.mxu1 %v338_v5  ;;  %v337_v6 = vld [vmem:[%s536_s3] sm:$0xff]  ;;  %222 = vmatpush.bf16.msra.mxu3 %v343_v25  ;;  %v342_v26 = vld [vmem:[%s540_s7 + $0x10] sm:$0xff]  ;;  %v341_v27 = vld [vmem:[%s540_s7 + $0x8] sm:$0xff]  ;;  %s248_s19 = sshll.u32 %s414_s18, 4  ;;  %s416_s23 = smov 8   ;;  %s249_s19 = int_to_ptr.vmem [resolvable:$true] %s248_s19 }
   0x6   :  { %89 = vmatpush.bf16.msra.mxu0 %v335_v1  ;;  %v349_v8 = vld [vmem:[%s535_s2] ss:$0 sm:$0xff]  ;;  %s417_s24 = smov [#allocation4]   ;;  %s263_s27 = sshll.u32 %s543_s10, 4  ;;  %s264_s27 = int_to_ptr.hbm [resolvable:$true] %s263_s27 }
   0x7   :  { %v339_v18 = vld [vmem:[%s538_s5] sm:$0xff]  ;;  %s261_s25 = sshll.u32 %s417_s24, 4  ;;  %s262_s25 = int_to_ptr.vmem [resolvable:$true] %s261_s25 }
   0x8   :  { %166 = vmatpush.bf16.msra.mxu2 %v339_v18  ;;  %v350_v20 = vld [vmem:[%s537_s4] ss:$0 sm:$0xff] }
   0x9   :  { %135 = vmatpush.bf16.msra.mxu1 %v337_v6  ;;  %223 = vmatpush.bf16.msra.mxu3 %v342_v26  ;;  %v340_v28 = vld [vmem:[%s540_s7] sm:$0xff] }
   0xa   :  { %90 = vmatpush.bf16.msra.mxu0 %v334_v2  ;;  %v351_v30 = vld [vmem:[%s539_s6] ss:$0 sm:$0xff]  ;;  %s413_s6 = smov 64  }
   0xb   :  { %v352_v40 = vld [vmem:[%s541_s8] ss:$0 sm:$0xff]  ;;  %s415_s8 = smov 128  }
   0xd   :  { %224 = vmatpush.bf16.msra.mxu3 %v341_v27 }
   0xe   :  { %91 = vmatpush.bf16.msra.mxu0 %v333_v3 }
  0x11   :  { %300 = vmatmul.msk.bf16.vlgmr.msra.gmra.mxu0 %vm80_vm0, %v332_v4  ;;  %225 = vmatpush.bf16.msra.mxu3 %v340_v28 }
  0x8e   :  { %v93_v7 = vpop.f32.mrf.mxu0 }
  0x8f   :  { %v94_v10 = vadd.f32 %v349_v8, %v93_v7 }
  0x96   :  { %v95_v9 = vpop.f32.mrf.mxu0 }
  0x97   :  { %v96_v11 = vadd.f32 %v349_v8, %v95_v9 }
  0x99   :  { %v98_v12 = vpack.c.bf16 %v96_v11, %v94_v10 }
  0x9b   :  { %v99_v13 = vunpack.c.l.bf16 %v98_v12  ;;  %v100_v14 = vunpack.c.h.bf16 %v98_v12 }
  0x9d   :  { %353 = vtanh.f32 %v99_v13 }
  0x9e   :  { %355 = vtanh.f32 %v100_v14 }
  0xa3   :  { %v354_v15 = vpop.eup %353 }
  0xa4   :  { %v356_v16 = vpop.eup %355 }
  0xa5   :  { %v103_v17 = vpack.c.bf16 %v356_v16, %v354_v15 }
  0xa7   :  { %309 = vmatmul.msk.bf16.vlgmr.msra.gmra.mxu1 %vm124_vm1, %v103_v17 }
 0x124   :  { %v137_v19 = vpop.f32.mrf.mxu1 }
 0x125   :  { %v138_v22 = vadd.f32 %v350_v20, %v137_v19 }
 0x12c   :  { %v139_v21 = vpop.f32.mrf.mxu1 }
 0x12d   :  { %v140_v23 = vadd.f32 %v350_v20, %v139_v21 }
 0x12f   :  { %v142_v24 = vpack.c.bf16 %v140_v23, %v138_v22 }
 0x131   :  { %314 = vmatmul.msk.bf16.vlgmr.msra.gmra.mxu2 %vm155_vm2, %v142_v24 }
 0x1b4   :  { %v168_v29 = vpop.f32.mrf.mxu2 }
 0x1b5   :  { %v169_v32 = vadd.f32 %v351_v30, %v168_v29 }
 0x1bc   :  { %v170_v31 = vpop.f32.mrf.mxu2 }
 0x1bd   :  { %v171_v33 = vadd.f32 %v351_v30, %v170_v31 }
 0x1bf   :  { %v173_v34 = vpack.c.bf16 %v171_v33, %v169_v32 }
 0x1c1   :  { %v174_v35 = vunpack.c.l.bf16 %v173_v34  ;;  %v175_v36 = vunpack.c.h.bf16 %v173_v34 }
 0x1c3   :  { %357 = vtanh.f32 %v174_v35 }
 0x1c4   :  { %359 = vtanh.f32 %v175_v36 }
 0x1c9   :  { %v358_v37 = vpop.eup %357 }
 0x1ca   :  { %v360_v38 = vpop.eup %359 }
 0x1cb   :  { %v178_v39 = vpack.c.bf16 %v360_v38, %v358_v37 }
 0x1cd   :  { %331 = vmatmul.msk.bf16.vlgmr.msra.gmra.mxu3 %vm80_vm0, %v178_v39 }
 0x250   :  { %v227_v41 = vpop.f32.mrf.mxu3 }
 0x251   :  { %v228_v42 = vadd.f32 %v352_v40, %v227_v41 }
 0x253   :  { %232 = vst.msk [vmem:[#allocation2] sm:$0xff] %vm80_vm0, %v228_v42  ;;  %236 = vrot.lane.b32.xlu0 %v228_v42, %s413_s6 }
 0x258   :  { %v229_v43 = vpop.f32.mrf.mxu3 }
 0x259   :  { %v230_v44 = vadd.f32 %v352_v40, %v229_v43 }
 0x25b   :  { %233 = vst.msk [vmem:[#allocation2 + $0x8] sm:$0xff] %vm80_vm0, %v230_v44  ;;  %238 = vrot.lane.b32.xlu0 %v230_v44, %s413_s6 }
 0x25c   :  { %256 = dma.vmem_to_hbm [thread:$0]  %s249_s19, 256, %s251_s22, [#allocation3], %s415_s8, %s415_s8, %s416_s23  }
 0x2c5   :  { %v237_v45 = vpop.permute.xlu0 %236 }
 0x2c6   :  { %242 = vst.msk [vmem:[#allocation4] sm:$0xff] %vm80_vm0, %v237_v45 }
 0x2cd   :  { %v239_v46 = vpop.permute.xlu0 %238 }
 0x2ce   :  { %243 = vst.msk [vmem:[#allocation4 + $0x8] sm:$0xff] %vm80_vm0, %v239_v46 }
 0x2cf   :  { %269 = dma.vmem_to_hbm [thread:$0]  %s262_s25, 256, %s264_s27, [#allocation5], %s415_s8, %s415_s8, %s416_s23  }
 0x2d0   :  { %409 = dma.done.wait [#allocation3], 256  }
 0x2d1   :  { %410 = vsyncadd [#allocation3], 4294967040 }
 0x2d2   :  { %411 = dma.done.wait [#allocation5], 256  }
 0x2d3   :  { %412 = vsyncadd [#allocation5], 4294967040 }
 0x2d4   :  { %278 = vsyncpa [#allocation3], 1 }
 0x2d5   :  { %279 = vsyncpa [#allocation5], 1 }

</bundles_post_ra>
